<compile_context>
chip_gen: v6e
topology: v6e:2x2x1
jax: 0.10.0
libtpu: 0.0.40
codegen_flags: <defaults>
</compile_context>

<pallas_src>
import functools

import jax
import jax.numpy as jnp
from jax import lax
from jax.experimental import pallas as pl
from jax.experimental.pallas import tpu as pltpu

_LANES = 128
_NUM_CORES = 2   # leading "parallel" grid axis: both v7x TCs; harmless on v5e/v6e.


def _round_up(x, m):
    return ((x + m - 1) // m) * m


def _dice_bce_kernel(x_ref, t_ref, o_ref, acc_ref, *,
                     n_valid, nb_full, nb_grid, bpc, block_rows, strip_rows):
    """Accumulate per-core partial sums for one (block_rows, 128) tile.

    x_ref, t_ref : (block_rows, 128) logits / targets tiles (native dtype)
    o_ref        : (1, 4, 8, 128) per-core partial sums [sum(p*t), sum(p), sum(t), sum(bce)]
    acc_ref      : (4, 8, 128) f32 accumulator scratch
    """
    c = pl.program_id(0)          # core index
    j = pl.program_id(1)          # block index within this core
    gb = c * bpc + j              # global block index

    @pl.when(j == 0)
    def _():
        acc_ref[...] = jnp.zeros_like(acc_ref)

    n_strips = block_rows // strip_rows
    block_elems = block_rows * _LANES

    def make_strip_body(masked):
        def body(s, carry):
            r0 = pl.multiple_of(s * strip_rows, 8)
            x = x_ref[pl.ds(r0, strip_rows), :].astype(jnp.float32)
            t = t_ref[pl.ds(r0, strip_rows), :].astype(jnp.float32)

            # One exp per element, shared by sigmoid and both log terms (EUP).
            e = jnp.exp(-jnp.abs(x))
            r = 1.0 / (1.0 + e)
            p = jnp.where(x >= 0.0, r, e * r)              # sigmoid(x)
            # log1p(e) without relying on a log1p lowering: for e in (0,1],
            # e - e^2/2 lower-bounds log(1+e) and equals it (to f32) when 1+e rounds to 1.
            log1p_e = jnp.maximum(jnp.log(1.0 + e), e - 0.5 * e * e)
            # PyTorch binary_cross_entropy clamps log terms at -100.
            log_p = jnp.maximum(jnp.minimum(x, 0.0) - log1p_e, -100.0)     # log(sigmoid(x))
            log_1mp = jnp.maximum(jnp.minimum(-x, 0.0) - log1p_e, -100.0)  # log(1-sigmoid(x))
            bce = -(t * log_p + (1.0 - t) * log_1mp)
            pt = p * t

            if masked:
                rows_i = lax.broadcasted_iota(jnp.int32, x.shape, 0)
                lanes_i = lax.broadcasted_iota(jnp.int32, x.shape, 1)
                idx = gb * block_elems + (r0 + rows_i) * _LANES + lanes_i
                valid = idx < n_valid
                zero = jnp.zeros_like(x)
                pt = jnp.where(valid, pt, zero)
                p = jnp.where(valid, p, zero)
                t = jnp.where(valid, t, zero)
                bce = jnp.where(valid, bce, zero)

            def red(v):   # (strip_rows, 128) -> (8, 128): cross-vreg VPU adds only.
                return v.reshape(strip_rows // 8, 8, _LANES).sum(axis=0)

            acc_ref[0] += red(pt)
            acc_ref[1] += red(p)
            acc_ref[2] += red(t)
            acc_ref[3] += red(bce)
            return carry
        return body

    if nb_full >= nb_grid:
        # Every grid block is fully valid: single unmasked path, no per-element mask work.
        lax.fori_loop(0, n_strips, make_strip_body(False), 0)
    else:
        @pl.when(gb < nb_full)
        def _():
            lax.fori_loop(0, n_strips, make_strip_body(False), 0)

        @pl.when(gb >= nb_full)
        def _():
            # Partially-valid last block + (index-clamped) ghost blocks: masked path.
            lax.fori_loop(0, n_strips, make_strip_body(True), 0)

    @pl.when(j == pl.num_programs(1) - 1)
    def _():
        o_ref[0] = acc_ref[...]


def dice_bce_loss(logits, targets, smooth=1.0, block_rows=4096, strip_rows=512):
    """Fused DiceBCE loss (forward).  Returns a scalar float32."""
    if logits.shape != targets.shape:
        raise ValueError("logits and targets must have the same shape")
    n = int(logits.size)
    if n == 0:
        raise ValueError("DiceBCELoss is undefined for empty inputs")

    def _sublanes(dt):   # 8 for 4-byte, 16 for 2-byte, 32 for 1-byte dtypes
        return 8 * max(1, 4 // jnp.dtype(dt).itemsize)

    sub = max(_sublanes(logits.dtype), _sublanes(targets.dtype))
    pad_unit = sub * _LANES

    x = jnp.ravel(logits)            # native dtype, no host-side astype
    t = jnp.ravel(targets)
    n_padded = _round_up(n, pad_unit)
    if n_padded != n:
        # Only fires when n isn't sublane*lane aligned; pads < pad_unit elements.
        x = jnp.pad(x, (0, n_padded - n))
        t = jnp.pad(t, (0, n_padded - n))
    rows = n_padded // _LANES
    x2 = x.reshape(rows, _LANES)
    t2 = t.reshape(rows, _LANES)

    # Tile rows: big to amortize per-step overhead, multiple of the sublane packing
    # unit, capped by the array size.  2 inputs x 2 buffers stays far under v7x 64 MiB.
    tm = max(sub, (min(int(block_rows), rows) // sub) * sub)
    strip = max(sub, (min(int(strip_rows), tm) // sub) * sub)
    while tm % strip != 0:
        strip -= sub

    nb_real = pl.cdiv(rows, tm)            # real blocks (last one may be row-partial)
    bpc = pl.cdiv(nb_real, _NUM_CORES)     # blocks per core
    nb_grid = _NUM_CORES * bpc             # grid blocks (may include one ghost block)
    nb_full = n // (tm * _LANES)           # blocks containing only valid elements

    def in_index(c, j):
        # Clamp ghost blocks (gb >= nb_real) onto the last real block; their
        # contribution is masked to zero inside the kernel.
        return (jnp.minimum(c * bpc + j, nb_real - 1), 0)

    kernel = functools.partial(
        _dice_bce_kernel,
        n_valid=n, nb_full=nb_full, nb_grid=nb_grid, bpc=bpc,
        block_rows=tm, strip_rows=strip)

    partials = pl.pallas_call(
        kernel,
        out_shape=jax.ShapeDtypeStruct((_NUM_CORES, 4, 8, _LANES), jnp.float32),
        grid_spec=pltpu.PrefetchScalarGridSpec(
            num_scalar_prefetch=0,
            grid=(_NUM_CORES, bpc),
            in_specs=[
                pl.BlockSpec((tm, _LANES), in_index),
                pl.BlockSpec((tm, _LANES), in_index),
            ],
            out_specs=pl.BlockSpec((1, 4, 8, _LANES), lambda c, j: (c, 0, 0, 0)),
            scratch_shapes=[pltpu.VMEM((4, 8, _LANES), jnp.float32)],
        ),
        compiler_params=pltpu.CompilerParams(
            # Core axis parallel (megacore), block axis is the carried reduction.
            dimension_semantics=("parallel", "arbitrary"),
            # Above v5e's 16 MiB default, below v7x's 64 MiB physical VMEM.
            vmem_limit_bytes=48 * 1024 * 1024,
        ),
    )(x2, t2)

    # Tiny scalar epilogue (4*8*128 floats per core) in plain JAX.
    sums = jnp.sum(partials, axis=(0, 2, 3))          # (4,)
    inter, p_sum, t_sum, bce_sum = sums[0], sums[1], sums[2], sums[3]
    dice_loss = 1.0 - (2.0 * inter + float(smooth)) / (p_sum + t_sum + float(smooth))
    bce_mean = bce_sum / float(n)
    return bce_mean + dice_loss


if __name__ == "__main__":
    # Segmentation-style shapes: [batch, channels, H, W].
    batch, channels, spatial = 2, 4, 16
    shape = (batch, channels, spatial, spatial)

    key = jax.random.PRNGKey(0)
    k_x, k_t = jax.random.split(key)
    logits = jax.random.normal(k_x, shape, dtype=jnp.float32)
    targets = (jax.random.uniform(k_t, shape) > 0.5).astype(jnp.float32)

    loss = dice_bce_loss(logits, targets, smooth=1.0)
    loss = jax.block_until_ready(loss)

    # Pure-JAX reference implementing the PyTorch module verbatim.
    p_ref = jax.nn.sigmoid(logits).reshape(-1)
    t_ref = targets.reshape(-1)
    inter = jnp.sum(p_ref * t_ref)
    dice_ref = 1.0 - (2.0 * inter + 1.0) / (jnp.sum(p_ref) + jnp.sum(t_ref) + 1.0)
    log_p = jnp.maximum(jnp.log(p_ref), -100.0)
    log_1mp = jnp.maximum(jnp.log(1.0 - p_ref), -100.0)
    bce_ref = jnp.mean(-(t_ref * log_p + (1.0 - t_ref) * log_1mp))
    ref = bce_ref + dice_ref

    assert loss.shape == ()
    assert jnp.allclose(loss, ref, atol=1e-4, rtol=1e-4), (loss, ref)

    print("KERNEL_OK")
</pallas_src>

<mosaic_0001>
module attributes {stable_mosaic.version = 11 : i64} {
  func.func @_dice_bce_kernel(%arg0: i32, %arg1: i32, %arg2: memref<16x128xf32, #tpu.memory_space<vmem>>, %arg3: memref<16x128xf32, #tpu.memory_space<vmem>>, %arg4: memref<1x4x8x128xf32, #tpu.memory_space<vmem>>, %arg5: memref<4x8x128xf32, #tpu.memory_space<vmem>>) attributes {dimension_semantics = [#tpu.dimension_semantics<parallel>, #tpu.dimension_semantics<arbitrary>], iteration_bounds = array<i64: 2, 1>, scalar_prefetch = 0 : i64, scratch_operands = 1 : i64, tpu.core_type = #tpu.core_type<tc>, window_params = [{transform_indices = @transform_0, window_bounds = array<i64: 16, 128>}, {transform_indices = @transform_1, window_bounds = array<i64: 16, 128>}, {transform_indices = @transform_2, window_bounds = array<i64: 1, 4, 8, 128>}]} {
    %c1_i32 = arith.constant 1 : i32
    %0 = arith.muli %arg0, %c1_i32 : i32
    %1 = arith.addi %0, %arg1 : i32
    %c0_i32 = arith.constant 0 : i32
    %2 = arith.cmpi eq, %arg1, %c0_i32 : i32
    %3 = arith.extui %2 : i1 to i32
    %c0_i32_0 = arith.constant 0 : i32
    %4 = arith.cmpi ne, %3, %c0_i32_0 : i32
    scf.if %4 {
      %cst = arith.constant 0.000000e+00 : f32
      %14 = vector.broadcast %cst : f32 to vector<4x8x128xf32>
      %c0 = arith.constant 0 : index
      %c0_7 = arith.constant 0 : index
      %c0_8 = arith.constant 0 : index
      %15 = vector.load %arg5[%c0, %c0_7, %c0_8] : memref<4x8x128xf32, #tpu.memory_space<vmem>>, vector<4x8x128xf32>
      tpu.vector_store %arg5[%c0, %c0_7, %c0_8], %14 {strides = array<i32>} : memref<4x8x128xf32, #tpu.memory_space<vmem>>, vector<4x8x128xf32>,
    } else {
    }
    %c1_i32_1 = arith.constant 1 : i32
    %5 = arith.cmpi slt, %1, %c1_i32_1 : i32
    %6 = arith.extui %5 : i1 to i32
    %c0_i32_2 = arith.constant 0 : i32
    %7 = arith.cmpi ne, %6, %c0_i32_2 : i32
    scf.if %7 {
      %c0_i32_7 = arith.constant 0 : i32
      %c16_i32 = arith.constant 16 : i32
      %14 = arith.muli %c0_i32_7, %c16_i32 : i32
      %15 = tpu.assume_multiple %14, 8 : i32
      %16 = arith.index_cast %15 : i32 to index
      %c0 = arith.constant 0 : index
      %17 = vector.load %arg2[%16, %c0] : memref<16x128xf32, #tpu.memory_space<vmem>>, vector<16x128xf32>
      %18 = arith.index_cast %15 : i32 to index
      %c0_8 = arith.constant 0 : index
      %19 = vector.load %arg3[%18, %c0_8] : memref<16x128xf32, #tpu.memory_space<vmem>>, vector<16x128xf32>
      %20 = math.absf %17 : vector<16x128xf32>
      %cst = arith.constant 0.000000e+00 : f32
      %21 = vector.broadcast %cst : f32 to vector<16x128xf32>
      %22 = arith.subf %21, %20 : vector<16x128xf32>
      %23 = math.exp %22 : vector<16x128xf32>
      %cst_9 = arith.constant 1.000000e+00 : f32
      %24 = vector.broadcast %cst_9 : f32 to vector<16x128xf32>
      %25 = arith.addf %24, %23 : vector<16x128xf32>
      %cst_10 = arith.constant 1.000000e+00 : f32
      %26 = vector.broadcast %cst_10 : f32 to vector<16x128xf32>
      %27 = arith.divf %26, %25 : vector<16x128xf32>
      %cst_11 = arith.constant 0.000000e+00 : f32
      %28 = vector.broadcast %cst_11 : f32 to vector<16x128xf32>
      %29 = arith.cmpf oge, %17, %28 : vector<16x128xf32>
      %30 = arith.mulf %23, %27 : vector<16x128xf32>
      %31 = arith.select %29, %27, %30 : vector<16x128xi1>, vector<16x128xf32>
      %cst_12 = arith.constant 1.000000e+00 : f32
      %32 = vector.broadcast %cst_12 : f32 to vector<16x128xf32>
      %33 = arith.addf %32, %23 : vector<16x128xf32>
      %34 = math.log %33 : vector<16x128xf32>
      %cst_13 = arith.constant 5.000000e-01 : f32
      %35 = vector.broadcast %cst_13 : f32 to vector<16x128xf32>
      %36 = arith.mulf %35, %23 : vector<16x128xf32>
      %37 = arith.mulf %36, %23 : vector<16x128xf32>
      %38 = arith.subf %23, %37 : vector<16x128xf32>
      %39 = arith.maximumf %34, %38 : vector<16x128xf32>
      %cst_14 = arith.constant 0.000000e+00 : f32
      %40 = vector.broadcast %cst_14 : f32 to vector<16x128xf32>
      %41 = arith.minimumf %17, %40 : vector<16x128xf32>
      %42 = arith.subf %41, %39 : vector<16x128xf32>
      %cst_15 = arith.constant -1.000000e+02 : f32
      %43 = vector.broadcast %cst_15 : f32 to vector<16x128xf32>
      %44 = arith.maximumf %42, %43 : vector<16x128xf32>
      %cst_16 = arith.constant 0.000000e+00 : f32
      %45 = vector.broadcast %cst_16 : f32 to vector<16x128xf32>
      %46 = arith.subf %45, %17 : vector<16x128xf32>
      %cst_17 = arith.constant 0.000000e+00 : f32
      %47 = vector.broadcast %cst_17 : f32 to vector<16x128xf32>
      %48 = arith.minimumf %46, %47 : vector<16x128xf32>
      %49 = arith.subf %48, %39 : vector<16x128xf32>
      %cst_18 = arith.constant -1.000000e+02 : f32
      %50 = vector.broadcast %cst_18 : f32 to vector<16x128xf32>
      %51 = arith.maximumf %49, %50 : vector<16x128xf32>
      %52 = arith.mulf %19, %44 : vector<16x128xf32>
      %cst_19 = arith.constant 1.000000e+00 : f32
      %53 = vector.broadcast %cst_19 : f32 to vector<16x128xf32>
      %54 = arith.subf %53, %19 : vector<16x128xf32>
      %55 = arith.mulf %54, %51 : vector<16x128xf32>
      %56 = arith.addf %52, %55 : vector<16x128xf32>
      %cst_20 = arith.constant 0.000000e+00 : f32
      %57 = vector.broadcast %cst_20 : f32 to vector<16x128xf32>
      %58 = arith.subf %57, %56 : vector<16x128xf32>
      %59 = arith.mulf %31, %19 : vector<16x128xf32>
      %c0_21 = arith.constant 0 : index
      %c0_22 = arith.constant 0 : index
      %c0_23 = arith.constant 0 : index
      %60 = vector.load %arg5[%c0_21, %c0_22, %c0_23] : memref<4x8x128xf32, #tpu.memory_space<vmem>>, vector<1x8x128xf32>
      %61 = vector.shape_cast %60 : vector<1x8x128xf32> to vector<8x128xf32>
      %62 = vector.shape_cast %59 : vector<16x128xf32> to vector<2x8x128xf32>
      %cst_24 = arith.constant dense<0.000000e+00> : vector<8x128xf32>
      %63 = vector.multi_reduction <add>, %62, %cst_24 [0] : vector<2x8x128xf32> to vector<8x128xf32>
      %64 = arith.addf %61, %63 : vector<8x128xf32>
      %c0_25 = arith.constant 0 : index
      %c0_26 = arith.constant 0 : index
      %c0_27 = arith.constant 0 : index
      %65 = vector.load %arg5[%c0_25, %c0_26, %c0_27] : memref<4x8x128xf32, #tpu.memory_space<vmem>>, vector<1x8x128xf32>
      %66 = vector.shape_cast %65 : vector<1x8x128xf32> to vector<8x128xf32>
      %67 = vector.shape_cast %64 : vector<8x128xf32> to vector<1x8x128xf32>
      tpu.vector_store %arg5[%c0_25, %c0_26, %c0_27], %67 {strides = array<i32>} : memref<4x8x128xf32, #tpu.memory_space<vmem>>, vector<1x8x128xf32>,
      %c1 = arith.constant 1 : index
      %c0_28 = arith.constant 0 : index
      %c0_29 = arith.constant 0 : index
      %68 = vector.load %arg5[%c1, %c0_28, %c0_29] : memref<4x8x128xf32, #tpu.memory_space<vmem>>, vector<1x8x128xf32>
      %69 = vector.shape_cast %68 : vector<1x8x128xf32> to vector<8x128xf32>
      %70 = vector.shape_cast %31 : vector<16x128xf32> to vector<2x8x128xf32>
      %cst_30 = arith.constant dense<0.000000e+00> : vector<8x128xf32>
      %71 = vector.multi_reduction <add>, %70, %cst_30 [0] : vector<2x8x128xf32> to vector<8x128xf32>
      %72 = arith.addf %69, %71 : vector<8x128xf32>
      %c1_31 = arith.constant 1 : index
      %c0_32 = arith.constant 0 : index
      %c0_33 = arith.constant 0 : index
      %73 = vector.load %arg5[%c1_31, %c0_32, %c0_33] : memref<4x8x128xf32, #tpu.memory_space<vmem>>, vector<1x8x128xf32>
      %74 = vector.shape_cast %73 : vector<1x8x128xf32> to vector<8x128xf32>
      %75 = vector.shape_cast %72 : vector<8x128xf32> to vector<1x8x128xf32>
      tpu.vector_store %arg5[%c1_31, %c0_32, %c0_33], %75 {strides = array<i32>} : memref<4x8x128xf32, #tpu.memory_space<vmem>>, vector<1x8x128xf32>,
      %c2 = arith.constant 2 : index
      %c0_34 = arith.constant 0 : index
      %c0_35 = arith.constant 0 : index
      %76 = vector.load %arg5[%c2, %c0_34, %c0_35] : memref<4x8x128xf32, #tpu.memory_space<vmem>>, vector<1x8x128xf32>
      %77 = vector.shape_cast %76 : vector<1x8x128xf32> to vector<8x128xf32>
      %78 = vector.shape_cast %19 : vector<16x128xf32> to vector<2x8x128xf32>
      %cst_36 = arith.constant dense<0.000000e+00> : vector<8x128xf32>
      %79 = vector.multi_reduction <add>, %78, %cst_36 [0] : vector<2x8x128xf32> to vector<8x128xf32>
      %80 = arith.addf %77, %79 : vector<8x128xf32>
      %c2_37 = arith.constant 2 : index
      %c0_38 = arith.constant 0 : index
      %c0_39 = arith.constant 0 : index
      %81 = vector.load %arg5[%c2_37, %c0_38, %c0_39] : memref<4x8x128xf32, #tpu.memory_space<vmem>>, vector<1x8x128xf32>
      %82 = vector.shape_cast %81 : vector<1x8x128xf32> to vector<8x128xf32>
      %83 = vector.shape_cast %80 : vector<8x128xf32> to vector<1x8x128xf32>
      tpu.vector_store %arg5[%c2_37, %c0_38, %c0_39], %83 {strides = array<i32>} : memref<4x8x128xf32, #tpu.memory_space<vmem>>, vector<1x8x128xf32>,
      %c3 = arith.constant 3 : index
      %c0_40 = arith.constant 0 : index
      %c0_41 = arith.constant 0 : index
      %84 = vector.load %arg5[%c3, %c0_40, %c0_41] : memref<4x8x128xf32, #tpu.memory_space<vmem>>, vector<1x8x128xf32>
      %85 = vector.shape_cast %84 : vector<1x8x128xf32> to vector<8x128xf32>
      %86 = vector.shape_cast %58 : vector<16x128xf32> to vector<2x8x128xf32>
      %cst_42 = arith.constant dense<0.000000e+00> : vector<8x128xf32>
      %87 = vector.multi_reduction <add>, %86, %cst_42 [0] : vector<2x8x128xf32> to vector<8x128xf32>
      %88 = arith.addf %85, %87 : vector<8x128xf32>
      %c3_43 = arith.constant 3 : index
      %c0_44 = arith.constant 0 : index
      %c0_45 = arith.constant 0 : index
      %89 = vector.load %arg5[%c3_43, %c0_44, %c0_45] : memref<4x8x128xf32, #tpu.memory_space<vmem>>, vector<1x8x128xf32>
      %90 = vector.shape_cast %89 : vector<1x8x128xf32> to vector<8x128xf32>
      %91 = vector.shape_cast %88 : vector<8x128xf32> to vector<1x8x128xf32>
      tpu.vector_store %arg5[%c3_43, %c0_44, %c0_45], %91 {strides = array<i32>} : memref<4x8x128xf32, #tpu.memory_space<vmem>>, vector<1x8x128xf32>,
      %c1_i32_46 = arith.constant 1 : i32
    } else {
    }
    %c1_i32_3 = arith.constant 1 : i32
    %8 = arith.cmpi sge, %1, %c1_i32_3 : i32
    %9 = arith.extui %8 : i1 to i32
    %c0_i32_4 = arith.constant 0 : i32
    %10 = arith.cmpi ne, %9, %c0_i32_4 : i32
    scf.if %10 {
      %c0_i32_7 = arith.constant 0 : i32
      %c16_i32 = arith.constant 16 : i32
      %14 = arith.muli %c0_i32_7, %c16_i32 : i32
      %15 = tpu.assume_multiple %14, 8 : i32
      %16 = arith.index_cast %15 : i32 to index
      %c0 = arith.constant 0 : index
      %17 = vector.load %arg2[%16, %c0] : memref<16x128xf32, #tpu.memory_space<vmem>>, vector<16x128xf32>
      %18 = arith.index_cast %15 : i32 to index
      %c0_8 = arith.constant 0 : index
      %19 = vector.load %arg3[%18, %c0_8] : memref<16x128xf32, #tpu.memory_space<vmem>>, vector<16x128xf32>
      %20 = math.absf %17 : vector<16x128xf32>
      %cst = arith.constant 0.000000e+00 : f32
      %21 = vector.broadcast %cst : f32 to vector<16x128xf32>
      %22 = arith.subf %21, %20 : vector<16x128xf32>
      %23 = math.exp %22 : vector<16x128xf32>
      %cst_9 = arith.constant 1.000000e+00 : f32
      %24 = vector.broadcast %cst_9 : f32 to vector<16x128xf32>
      %25 = arith.addf %24, %23 : vector<16x128xf32>
      %cst_10 = arith.constant 1.000000e+00 : f32
      %26 = vector.broadcast %cst_10 : f32 to vector<16x128xf32>
      %27 = arith.divf %26, %25 : vector<16x128xf32>
      %cst_11 = arith.constant 0.000000e+00 : f32
      %28 = vector.broadcast %cst_11 : f32 to vector<16x128xf32>
      %29 = arith.cmpf oge, %17, %28 : vector<16x128xf32>
      %30 = arith.mulf %23, %27 : vector<16x128xf32>
      %31 = arith.select %29, %27, %30 : vector<16x128xi1>, vector<16x128xf32>
      %cst_12 = arith.constant 1.000000e+00 : f32
      %32 = vector.broadcast %cst_12 : f32 to vector<16x128xf32>
      %33 = arith.addf %32, %23 : vector<16x128xf32>
      %34 = math.log %33 : vector<16x128xf32>
      %cst_13 = arith.constant 5.000000e-01 : f32
      %35 = vector.broadcast %cst_13 : f32 to vector<16x128xf32>
      %36 = arith.mulf %35, %23 : vector<16x128xf32>
      %37 = arith.mulf %36, %23 : vector<16x128xf32>
      %38 = arith.subf %23, %37 : vector<16x128xf32>
      %39 = arith.maximumf %34, %38 : vector<16x128xf32>
      %cst_14 = arith.constant 0.000000e+00 : f32
      %40 = vector.broadcast %cst_14 : f32 to vector<16x128xf32>
      %41 = arith.minimumf %17, %40 : vector<16x128xf32>
      %42 = arith.subf %41, %39 : vector<16x128xf32>
      %cst_15 = arith.constant -1.000000e+02 : f32
      %43 = vector.broadcast %cst_15 : f32 to vector<16x128xf32>
      %44 = arith.maximumf %42, %43 : vector<16x128xf32>
      %cst_16 = arith.constant 0.000000e+00 : f32
      %45 = vector.broadcast %cst_16 : f32 to vector<16x128xf32>
      %46 = arith.subf %45, %17 : vector<16x128xf32>
      %cst_17 = arith.constant 0.000000e+00 : f32
      %47 = vector.broadcast %cst_17 : f32 to vector<16x128xf32>
      %48 = arith.minimumf %46, %47 : vector<16x128xf32>
      %49 = arith.subf %48, %39 : vector<16x128xf32>
      %cst_18 = arith.constant -1.000000e+02 : f32
      %50 = vector.broadcast %cst_18 : f32 to vector<16x128xf32>
      %51 = arith.maximumf %49, %50 : vector<16x128xf32>
      %52 = arith.mulf %19, %44 : vector<16x128xf32>
      %cst_19 = arith.constant 1.000000e+00 : f32
      %53 = vector.broadcast %cst_19 : f32 to vector<16x128xf32>
      %54 = arith.subf %53, %19 : vector<16x128xf32>
      %55 = arith.mulf %54, %51 : vector<16x128xf32>
      %56 = arith.addf %52, %55 : vector<16x128xf32>
      %cst_20 = arith.constant 0.000000e+00 : f32
      %57 = vector.broadcast %cst_20 : f32 to vector<16x128xf32>
      %58 = arith.subf %57, %56 : vector<16x128xf32>
      %59 = arith.mulf %31, %19 : vector<16x128xf32>
      %60 = tpu.iota {dimensions = array<i32: 0>} : vector<16x128xi32>
      %61 = tpu.iota {dimensions = array<i32: 1>} : vector<16x128xi32>
      %c2048_i32 = arith.constant 2048 : i32
      %62 = arith.muli %1, %c2048_i32 : i32
      %63 = vector.broadcast %15 : i32 to vector<16x128xi32>
      %64 = arith.addi %63, %60 : vector<16x128xi32>
      %c128_i32 = arith.constant 128 : i32
      %65 = vector.broadcast %c128_i32 : i32 to vector<16x128xi32>
      %66 = arith.muli %64, %65 : vector<16x128xi32>
      %67 = vector.broadcast %62 : i32 to vector<16x128xi32>
      %68 = arith.addi %67, %66 : vector<16x128xi32>
      %69 = arith.addi %68, %61 : vector<16x128xi32>
      %c2048_i32_21 = arith.constant 2048 : i32
      %70 = vector.broadcast %c2048_i32_21 : i32 to vector<16x128xi32>
      %71 = arith.cmpi slt, %69, %70 : vector<16x128xi32>
      %cst_22 = arith.constant 0.000000e+00 : f32
      %72 = vector.broadcast %cst_22 : f32 to vector<16x128xf32>
      %73 = arith.select %71, %59, %72 : vector<16x128xi1>, vector<16x128xf32>
      %74 = arith.select %71, %31, %72 : vector<16x128xi1>, vector<16x128xf32>
      %75 = arith.select %71, %19, %72 : vector<16x128xi1>, vector<16x128xf32>
      %76 = arith.select %71, %58, %72 : vector<16x128xi1>, vector<16x128xf32>
      %c0_23 = arith.constant 0 : index
      %c0_24 = arith.constant 0 : index
      %c0_25 = arith.constant 0 : index
      %77 = vector.load %arg5[%c0_23, %c0_24, %c0_25] : memref<4x8x128xf32, #tpu.memory_space<vmem>>, vector<1x8x128xf32>
      %78 = vector.shape_cast %77 : vector<1x8x128xf32> to vector<8x128xf32>
      %79 = vector.shape_cast %73 : vector<16x128xf32> to vector<2x8x128xf32>
      %cst_26 = arith.constant dense<0.000000e+00> : vector<8x128xf32>
      %80 = vector.multi_reduction <add>, %79, %cst_26 [0] : vector<2x8x128xf32> to vector<8x128xf32>
      %81 = arith.addf %78, %80 : vector<8x128xf32>
      %c0_27 = arith.constant 0 : index
      %c0_28 = arith.constant 0 : index
      %c0_29 = arith.constant 0 : index
      %82 = vector.load %arg5[%c0_27, %c0_28, %c0_29] : memref<4x8x128xf32, #tpu.memory_space<vmem>>, vector<1x8x128xf32>
      %83 = vector.shape_cast %82 : vector<1x8x128xf32> to vector<8x128xf32>
      %84 = vector.shape_cast %81 : vector<8x128xf32> to vector<1x8x128xf32>
      tpu.vector_store %arg5[%c0_27, %c0_28, %c0_29], %84 {strides = array<i32>} : memref<4x8x128xf32, #tpu.memory_space<vmem>>, vector<1x8x128xf32>,
      %c1 = arith.constant 1 : index
      %c0_30 = arith.constant 0 : index
      %c0_31 = arith.constant 0 : index
      %85 = vector.load %arg5[%c1, %c0_30, %c0_31] : memref<4x8x128xf32, #tpu.memory_space<vmem>>, vector<1x8x128xf32>
      %86 = vector.shape_cast %85 : vector<1x8x128xf32> to vector<8x128xf32>
      %87 = vector.shape_cast %74 : vector<16x128xf32> to vector<2x8x128xf32>
      %cst_32 = arith.constant dense<0.000000e+00> : vector<8x128xf32>
      %88 = vector.multi_reduction <add>, %87, %cst_32 [0] : vector<2x8x128xf32> to vector<8x128xf32>
      %89 = arith.addf %86, %88 : vector<8x128xf32>
      %c1_33 = arith.constant 1 : index
      %c0_34 = arith.constant 0 : index
      %c0_35 = arith.constant 0 : index
      %90 = vector.load %arg5[%c1_33, %c0_34, %c0_35] : memref<4x8x128xf32, #tpu.memory_space<vmem>>, vector<1x8x128xf32>
      %91 = vector.shape_cast %90 : vector<1x8x128xf32> to vector<8x128xf32>
      %92 = vector.shape_cast %89 : vector<8x128xf32> to vector<1x8x128xf32>
      tpu.vector_store %arg5[%c1_33, %c0_34, %c0_35], %92 {strides = array<i32>} : memref<4x8x128xf32, #tpu.memory_space<vmem>>, vector<1x8x128xf32>,
      %c2 = arith.constant 2 : index
      %c0_36 = arith.constant 0 : index
      %c0_37 = arith.constant 0 : index
      %93 = vector.load %arg5[%c2, %c0_36, %c0_37] : memref<4x8x128xf32, #tpu.memory_space<vmem>>, vector<1x8x128xf32>
      %94 = vector.shape_cast %93 : vector<1x8x128xf32> to vector<8x128xf32>
      %95 = vector.shape_cast %75 : vector<16x128xf32> to vector<2x8x128xf32>
      %cst_38 = arith.constant dense<0.000000e+00> : vector<8x128xf32>
      %96 = vector.multi_reduction <add>, %95, %cst_38 [0] : vector<2x8x128xf32> to vector<8x128xf32>
      %97 = arith.addf %94, %96 : vector<8x128xf32>
      %c2_39 = arith.constant 2 : index
      %c0_40 = arith.constant 0 : index
      %c0_41 = arith.constant 0 : index
      %98 = vector.load %arg5[%c2_39, %c0_40, %c0_41] : memref<4x8x128xf32, #tpu.memory_space<vmem>>, vector<1x8x128xf32>
      %99 = vector.shape_cast %98 : vector<1x8x128xf32> to vector<8x128xf32>
      %100 = vector.shape_cast %97 : vector<8x128xf32> to vector<1x8x128xf32>
      tpu.vector_store %arg5[%c2_39, %c0_40, %c0_41], %100 {strides = array<i32>} : memref<4x8x128xf32, #tpu.memory_space<vmem>>, vector<1x8x128xf32>,
      %c3 = arith.constant 3 : index
      %c0_42 = arith.constant 0 : index
      %c0_43 = arith.constant 0 : index
      %101 = vector.load %arg5[%c3, %c0_42, %c0_43] : memref<4x8x128xf32, #tpu.memory_space<vmem>>, vector<1x8x128xf32>
      %102 = vector.shape_cast %101 : vector<1x8x128xf32> to vector<8x128xf32>
      %103 = vector.shape_cast %76 : vector<16x128xf32> to vector<2x8x128xf32>
      %cst_44 = arith.constant dense<0.000000e+00> : vector<8x128xf32>
      %104 = vector.multi_reduction <add>, %103, %cst_44 [0] : vector<2x8x128xf32> to vector<8x128xf32>
      %105 = arith.addf %102, %104 : vector<8x128xf32>
      %c3_45 = arith.constant 3 : index
      %c0_46 = arith.constant 0 : index
      %c0_47 = arith.constant 0 : index
      %106 = vector.load %arg5[%c3_45, %c0_46, %c0_47] : memref<4x8x128xf32, #tpu.memory_space<vmem>>, vector<1x8x128xf32>
      %107 = vector.shape_cast %106 : vector<1x8x128xf32> to vector<8x128xf32>
      %108 = vector.shape_cast %105 : vector<8x128xf32> to vector<1x8x128xf32>
      tpu.vector_store %arg5[%c3_45, %c0_46, %c0_47], %108 {strides = array<i32>} : memref<4x8x128xf32, #tpu.memory_space<vmem>>, vector<1x8x128xf32>,
      %c1_i32_48 = arith.constant 1 : i32
    } else {
    }
    %c0_i32_5 = arith.constant 0 : i32
    %11 = arith.cmpi eq, %arg1, %c0_i32_5 : i32
    %12 = arith.extui %11 : i1 to i32
    %c0_i32_6 = arith.constant 0 : i32
    %13 = arith.cmpi ne, %12, %c0_i32_6 : i32
    scf.if %13 {
      %c0 = arith.constant 0 : index
      %c0_7 = arith.constant 0 : index
      %c0_8 = arith.constant 0 : index
      %14 = vector.load %arg5[%c0, %c0_7, %c0_8] : memref<4x8x128xf32, #tpu.memory_space<vmem>>, vector<4x8x128xf32>
      %c0_9 = arith.constant 0 : index
      %c0_10 = arith.constant 0 : index
      %c0_11 = arith.constant 0 : index
      %c0_12 = arith.constant 0 : index
      %15 = vector.load %arg4[%c0_9, %c0_10, %c0_11, %c0_12] : memref<1x4x8x128xf32, #tpu.memory_space<vmem>>, vector<1x4x8x128xf32>
      %16 = vector.shape_cast %15 : vector<1x4x8x128xf32> to vector<4x8x128xf32>
      %17 = vector.shape_cast %14 : vector<4x8x128xf32> to vector<1x4x8x128xf32>
      tpu.vector_store %arg4[%c0_9, %c0_10, %c0_11, %c0_12], %17 {strides = array<i32>} : memref<1x4x8x128xf32, #tpu.memory_space<vmem>>, vector<1x4x8x128xf32>,
    } else {
    }
    return
  }
  func.func @transform_0(%arg0: i32, %arg1: i32) -> (i32, i32) {
    %c1_i32 = arith.constant 1 : i32
    %0 = arith.muli %arg0, %c1_i32 : i32
    %1 = arith.addi %0, %arg1 : i32
    %c0_i32 = arith.constant 0 : i32
    %2 = arith.minsi %1, %c0_i32 : i32
    %c0_i32_0 = arith.constant 0 : i32
    %c0_i32_1 = arith.constant 0 : i32
    return %2, %c0_i32_0 : i32, i32
  }
  func.func @transform_1(%arg0: i32, %arg1: i32) -> (i32, i32) {
    %c1_i32 = arith.constant 1 : i32
    %0 = arith.muli %arg0, %c1_i32 : i32
    %1 = arith.addi %0, %arg1 : i32
    %c0_i32 = arith.constant 0 : i32
    %2 = arith.minsi %1, %c0_i32 : i32
    %c0_i32_0 = arith.constant 0 : i32
    %c0_i32_1 = arith.constant 0 : i32
    return %2, %c0_i32_0 : i32, i32
  }
  func.func @transform_2(%arg0: i32, %arg1: i32) -> (i32, i32, i32, i32) {
    %c0_i32 = arith.constant 0 : i32
    %c0_i32_0 = arith.constant 0 : i32
    %c0_i32_1 = arith.constant 0 : i32
    %c0_i32_2 = arith.constant 0 : i32
    return %arg0, %c0_i32, %c0_i32_0, %c0_i32_1 : i32, i32, i32, i32
  }
}

</mosaic_0001>

<bundles_post_ra>
// kernel: tpu_custom_call.1
= control target key start
LH: loop header
LB: loop body
LE: loop exit
PB: predicated region body
PF: predicated region fallthrough
CT: control target
= control target key end

     0   :  { %7 = vsyncpa [#allocation4], 0  ;;  %s1182_s0 = inlined_call_operand.hbm [shape: f32[16,128], index: 0, kind: input, shape index: {}]   ;;  %s1183_s1 = inlined_call_operand.hbm [shape: f32[16,128], index: 1, kind: input, shape index: {}]   ;;  %s1184_s2 = inlined_call_operand.hbm [shape: f32[2,4,8,128], index: 2, kind: output, shape index: {}]  }
   0x1   :  { %9 = vsyncpa [#allocation4 + $0x1], 0 }
   0x2   :  { %10 = vsyncpa [#allocation7], 0 }
   0x3   :  { %12 = vsyncpa [#allocation7 + $0x1], 0 }
   0x4   :  { %13 = vsyncpa [#allocation5], 0 }
   0x5   :  { %15 = vsyncpa [#allocation5 + $0x1], 0  ;;  %s905_s9 = smov 0   ;;  %s907_s10 = smov 0  }
   0x6   :  { %s909_s11 = smov 0   ;;  %s911_s12 = smov 0  }
   0x7   :  { %s913_s13 = smov 0   ;;  %s915_s14 = smov 0  }
   0x8   :  { %s917_s15 = smov 0   ;;  %s919_s16 = smov 0  }
   0x9 LB: > { %s574_s17 = sadd.s32 4294967295, %s880_s16   ;;  %s575_s18 = sadd.s32 4294967294, %s880_s16   ;;  %s880_s16 = sphi %s919_s16, %s21_s16   ;;  %s876_s15 = sphi %s917_s15, %s1203_s15   ;;  %s872_s14 = sphi %s915_s14, %s1202_s14   ;;  %s868_s13 = sphi %s913_s13, %s1172_s13   ;;  %s864_s12 = sphi %s911_s12, %s1201_s12   ;;  %s860_s11 = sphi %s909_s11, %s1200_s11   ;;  %s856_s10 = sphi %s907_s10, %s1199_s10   ;;  %s852_s9 = sphi %s905_s9, %s1198_s9  }
   0xa   : > { %s33_s19 = sadd.s32 1, %s876_s15  ;;  %p849_p1 = scmp.ne.s32.totalorder %s868_s13, 0 }
   0xb   : > { %p35_p0 = scmp.ge.s32.totalorder %s33_s19, 2  ;;  %p54_p2 = scmp.eq.s32.totalorder %s880_s16, 0 }
   0xc   : > { %p59_p3 = scmp.ne.s32.totalorder %s868_s13, %s864_s12  ;;  %p60_p5 = scmp.eq.s32.totalorder %s574_s17, 0 }
   0xd   : > { %s1205_s19 = smov (%p35_p0, %s33_s19), 0  ;;  %p951_p4 = por %p849_p1, %p54_p2 }
   0xe   : > { %p955_p6 = por %p60_p5, %p59_p3  ;;  %s101_s22 = ssub.s32 %s876_s15, %s1205_s19 }
   0xf   : > { %p102_p7 = scmp.eq.s32.totalorder %s101_s22, 0  ;;  %s104_s23 = sadd.s32 1, %s860_s11 }
  0x10   : > { %s1188_s21 = scalar_select %p955_p6, 1, 0 }
  0x11   : > { %s963_s24 = scalar_select %p102_p7, %s860_s11, %s104_s23  }
  0x12   : > { %p114_p8 = scmp.ne.s32.totalorder %s860_s11, %s856_s10  ;;  %p115_p9 = scmp.eq.s32.totalorder %s574_s17, 1 }
  0x13   : > { %p120_p10 = scmp.ne.s32.totalorder %s856_s10, %s852_s9  ;;  %p121_p11 = scmp.eq.s32.totalorder %s575_s18, 1 }
  0x14   : > { %p969_p12 = por %p115_p9, %p114_p8  ;;  %p616_p1 = scmp.lt.s32.totalorder %s880_s16, 2 }
  0x15   : > { %p974_p0 = por %p121_p11, %p120_p10  ;;  %s882_s27 = smov [#allocation3]  }
  0x16   : > { %s1189_s25 = scalar_select %p969_p12, 1, 0 }
  0x17   : > { %s1190_s26 = scalar_select %p974_p0, 1, 0 }
  0x18   : > { %s155_s28 = sshll.u32 %s882_s27, 4  ;;  %p981_p2 = pnand %p616_p1, %p951_p4  ;;  %s156_s28 = int_to_ptr.vmem [resolvable:$true] %s155_s28 }
  0x19   : > { %s719_s4 = scalar_lea.hbm %s1182_s0, 256 }
  0x1a   : > { %p720_p3 = scmp.ne.s32.totalorder %s1182_s0, %s719_s4  ;;  %p721_p5 = pneg %p981_p2 }
  0x1b   : > { %p726_p8 = scmp.lt.s32.totalorder %s719_s4, %s719_s4 }
  0x1c   : > { %p722_p7 = pnand %p721_p5, %p720_p3 }
  0x1e   : > { %p723_p4 = pneg %p722_p7 }
  0x20   : > { %p728_p9 = pnand %p726_p8, %p723_p4 }
  0x22   : > { %731 = shalt.err (!%p728_p9)
}
  0x23   : > { %s732_s7 = scalar_lea.vmem %s156_s28, 256  ;;  %s739_s8 = scalar_lea.vmem %s156_s28, 512 }
  0x24   : > { %p733_p10 = scmp.ne.s32.totalorder %s156_s28, %s732_s7  ;;  %p740_p13 = scmp.lt.s32.totalorder %s156_s28, %s156_s28 }
  0x25   : > { %p741_p0 = scmp.lt.s32.totalorder %s739_s8, %s732_s7 }
  0x26   : > { %p735_p11 = pnand %p733_p10, %p721_p5 }
  0x27   : > { %p742_p12 = por %p741_p0, %p740_p13 }
  0x28   : > { %p736_p1 = pneg %p735_p11 }
  0x2a   : > { %p743_p6 = pnand %p742_p12, %p736_p1 }
  0x2c   : > { %746 = shalt.err (!%p743_p6)
}
  0x2d   : > { %s883_s12 = smov 128   ;;  %s884_s17 = smov 8  }
  0x2e   : > { %608 = dma.hbm_to_vmem [thread:$0]  (!%p981_p2), %s1182_s0, 256, %s156_s28, [#allocation4], %s883_s12, %s883_s12, %s884_s17  }
  0x2f   : > { %p584_p3 = scmp.ge.s32.totalorder %s880_s16, 1  ;;  %p187_p7 = scmp.lt.s32.totalorder %s880_s16, 3 }
  0x30   : > { %s885_s23 = smov [#allocation6]   ;;  %s747_s4 = scalar_lea.hbm %s1183_s1, 256 }
  0x31   : > { %p1006_p4 = pnand %p584_p3, %p187_p7  ;;  %s179_s27 = sshll.u32 %s885_s23, 4  ;;  %s180_s27 = int_to_ptr.vmem [resolvable:$true] %s179_s27 }
  0x32   : > { %p748_p6 = scmp.ne.s32.totalorder %s1183_s1, %s747_s4  ;;  %p754_p0 = scmp.lt.s32.totalorder %s747_s4, %s747_s4 }
  0x33   : > { %s1192_s22 = scalar_select %p1006_p4, 1, 0 }
  0x34   : > { %p750_p12 = pnand %p748_p6, %p721_p5 }
  0x36   : > { %p751_p13 = pneg %p750_p12 }
  0x38   : > { %p756_p8 = pnand %p754_p0, %p751_p13 }
  0x3a   : > { %759 = shalt.err (!%p756_p8)
}
  0x3b   : > { %s760_s28 = scalar_lea.vmem %s180_s27, 256  ;;  %s767_s7 = scalar_lea.vmem %s180_s27, 512 }
  0x3c   : > { %p761_p9 = scmp.ne.s32.totalorder %s180_s27, %s760_s28  ;;  %p768_p1 = scmp.lt.s32.totalorder %s180_s27, %s180_s27 }
  0x3d   : > { %p769_p3 = scmp.lt.s32.totalorder %s767_s7, %s760_s28 }
  0x3e   : > { %p763_p10 = pnand %p761_p9, %p721_p5 }
  0x3f   : > { %p770_p7 = por %p769_p3, %p768_p1 }
  0x40   : > { %p764_p11 = pneg %p763_p10 }
  0x42   : > { %p771_p4 = pnand %p770_p7, %p764_p11 }
  0x44   : > { %774 = shalt.err (!%p771_p4)
}
  0x45   : > { %611 = dma.hbm_to_vmem [thread:$0]  (!%p981_p2), %s1183_s1, 256, %s180_s27, [#allocation7], %s883_s12, %s883_s12, %s884_s17  }
  0x46   : > { %p1193_p6 = scmp.ne.s32.totalorder %s1192_s22, 0 }
  0x47   : > { %s193_s20 = sand.u32 (!%p1193_p6), 1, %s868_s13   ;;  %p1194_p5 = scmp.ne.s32.totalorder (!%p1193_p6), %s1188_s21, 0 }
  0x48   : > { %191 = sbr.rel (%p1193_p6) target bundleno = 238 (0xee), region = 28  ;;  %s585_s23 = sshll.u32 (!%p1193_p6), %s193_s20, 4 }
  0x49   : > { %s194_s30 = scalar_lea.sflag (!%p1193_p6), [#allocation4], %s193_s20  ;;  %s1030_s3 = scalar_lea.vmem (!%p1193_p6), [#allocation3], %s585_s23 }
  0x4d   : > { %838 = dma.done.wait (%p1194_p5), %s194_s30, 256  }
  0x4e   : > { %840 = vsyncadd (%p1194_p5), %s194_s30, 4294967040  ;;  %s203_s29 = scalar_lea.sflag [#allocation7], %s193_s20  ;;  %s1036_s4 = scalar_lea.vmem [#allocation6], %s585_s23 }
  0x4f   : > { %842 = dma.done.wait (%p1194_p5), %s203_s29, 256  }
  0x50   : > { %844 = vsyncadd (%p1194_p5), %s203_s29, 4294967040  ;;  %s229_s12 = sand.u32 1, %s856_s10   ;;  %v886_v0 = vmov 0.0   ;;  %p588_p2 = scmp.ge.s32.totalorder %s872_s14, 1 }
  0x51   : > { %s587_s17 = sshll.u32 %s229_s12, 5  ;;  %245 = vst [vmem:[#allocation2 + $0x10] sm:$0xff] %v886_v0  ;;  %246 = vst [vmem:[#allocation2] sm:$0xff] %v886_v0 }
  0x52   : > { %247 = vst [vmem:[#allocation2 + $0x18] sm:$0xff] %v886_v0  ;;  %248 = vst [vmem:[#allocation2 + $0x8] sm:$0xff] %v886_v0  ;;  %s1045_s22 = scalar_lea.vmem [#allocation8], %s587_s17  ;;  %252 = sbr.rel (%p588_p2) target bundleno = 146 (0x92), region = 44 }
  0x57   : > { %v253_v1 = vld [vmem:[%s1030_s3] sm:$0xff]  ;;  %v254_v2 = vld [vmem:[%s1030_s3 + $0x8] sm:$0xff] }
  0x58   : > { %v1051_v3 = vld [vmem:[%s1036_s4] sm:$0xff]  ;;  %v1054_v4 = vld [vmem:[%s1036_s4 + $0x8] sm:$0xff]  ;;  %v257_v5 = vand.u32 2147483647, %v253_v1  ;;  %v258_v6 = vand.u32 2147483647, %v254_v2 }
  0x59   : > { %v325_v7 = vld [vmem:[#allocation2 + $0x18] sm:$0xff]  ;;  %v326_v8 = vadd.f32 %v1054_v4, %v1051_v3  ;;  %v295_v22 = vsub.f32 0.0, %v253_v1  ;;  %vm271_vm0 = vcmp.ge.f32.partialorder %v253_v1, 0.0  ;;  %v296_v24 = vsub.f32 0.0, %v254_v2  ;;  %v320_v39 = vld [vmem:[#allocation2] sm:$0xff]  ;;  %v315_v45 = vld [vmem:[#allocation2 + $0x10] sm:$0xff] }
  0x5a   : > { %v259_v9 = vsub.f32 0.0, %v257_v5  ;;  %v260_v10 = vsub.f32 0.0, %v258_v6  ;;  %vm272_vm1 = vcmp.ge.f32.partialorder %v254_v2, 0.0  ;;  %v289_v31 = vmin.f32 %v253_v1, 0.0  ;;  %v330_v6 = vld [vmem:[#allocation2 + $0x8] sm:$0xff] }
  0x5b   : > { %v327_v11 = vadd.f32 %v326_v8, %v325_v7  ;;  %v290_v35 = vmin.f32 %v254_v2, 0.0  ;;  %v297_v36 = vmin.f32 %v295_v22, 0.0  ;;  %v298_v41 = vmin.f32 %v296_v24, 0.0 }
  0x5c   : > { %v261_v12 = vmul.f32 1.442695, %v259_v9  ;;  %v263_v13 = vmul.f32 1.442695, %v260_v10  ;;  %v305_v47 = vsub.f32 1.0, %v1051_v3  ;;  %v306_v54 = vsub.f32 1.0, %v1054_v4 }
  0x5d   : > { %328 = vst [vmem:[#allocation2 + $0x18] sm:$0xff] %v327_v11 }
  0x5e   : > { %695 = vpow2.f32 %v261_v12 }
  0x5f   : > { %697 = vpow2.f32 %v263_v13 }
  0x6b   : > { %v696_v14 = vpop.eup %695 }
  0x6c   : > { %v698_v15 = vpop.eup %697  ;;  %v265_v16 = vadd.f32 1.0, %v696_v14  ;;  %v281_v18 = vmul.f32 0.5, %v696_v14 }
  0x6d   : > { %v266_v17 = vadd.f32 1.0, %v698_v15  ;;  %v282_v19 = vmul.f32 0.5, %v698_v15 }
  0x6e   : > { %699 = vrcp.f32 %v265_v16  ;;  %v283_v20 = vmul.f32 %v696_v14, %v281_v18 }
  0x6f   : > { %701 = vrcp.f32 %v266_v17  ;;  %v284_v21 = vmul.f32 %v698_v15, %v282_v19 }
  0x70   : > { %703 = vlog2.f32 %v265_v16  ;;  %v285_v27 = vsub.f32 %v696_v14, %v283_v20 }
  0x71   : > { %705 = vlog2.f32 %v266_v17  ;;  %v286_v30 = vsub.f32 %v698_v15, %v284_v21 }
  0x7b   : > { %v700_v23 = vpop.eup %699 }
  0x7c   : > { %v702_v25 = vpop.eup %701  ;;  %v273_v26 = vmul.f32 %v700_v23, %v696_v14 }
  0x7d   : > { %v704_v28 = vpop.eup %703  ;;  %v274_v29 = vmul.f32 %v702_v25, %v698_v15 }
  0x7e   : > { %v706_v32 = vpop.eup %705  ;;  %v275_v33 = vsel %vm271_vm0, %v700_v23, %v273_v26  ;;  %v278_v34 = vmul.f32 0.6931472, %v704_v28 }
  0x7f   : > { %v276_v37 = vsel %vm272_vm1, %v702_v25, %v274_v29  ;;  %v313_v38 = vmul.f32 %v275_v33, %v1051_v3  ;;  %v280_v40 = vmul.f32 0.6931472, %v706_v32 }
  0x80   : > { %v314_v42 = vmul.f32 %v276_v37, %v1054_v4  ;;  %v321_v43 = vadd.f32 %v276_v37, %v275_v33  ;;  %v287_v44 = vmax.f32 %v278_v34, %v285_v27 }
  0x81   : > { %v288_v46 = vmax.f32 %v280_v40, %v286_v30 }
  0x82   : > { %v316_v48 = vadd.f32 %v314_v42, %v313_v38  ;;  %v322_v49 = vadd.f32 %v321_v43, %v320_v39  ;;  %v291_v50 = vsub.f32 %v289_v31, %v287_v44  ;;  %v299_v51 = vsub.f32 %v297_v36, %v287_v44 }
  0x83   : > { %v292_v52 = vsub.f32 %v290_v35, %v288_v46  ;;  %v300_v53 = vsub.f32 %v298_v41, %v288_v46 }
  0x84   : > { %v317_v55 = vadd.f32 %v316_v48, %v315_v45  ;;  %323 = vst [vmem:[#allocation2] sm:$0xff] %v322_v49  ;;  %v293_v56 = vmax.f32 %v291_v50, -100.0  ;;  %v301_v57 = vmax.f32 %v299_v51, -100.0 }
  0x85   : > { %v294_v58 = vmax.f32 %v292_v52, -100.0  ;;  %v302_v59 = vmax.f32 %v300_v53, -100.0 }
  0x86   : > { %318 = vst [vmem:[#allocation2 + $0x10] sm:$0xff] %v317_v55  ;;  %v303_v60 = vmul.f32 %v293_v56, %v1051_v3  ;;  %v307_v61 = vmul.f32 %v305_v47, %v301_v57 }
  0x87   : > { %v304_v62 = vmul.f32 %v294_v58, %v1054_v4  ;;  %v308_v63 = vmul.f32 %v306_v54, %v302_v59 }
  0x88   : > { %v309_v0 = vadd.f32 %v307_v61, %v303_v60 }
  0x89   : > { %v310_v1 = vadd.f32 %v308_v63, %v304_v62 }
  0x8a   : > { %v311_v2 = vsub.f32 0.0, %v309_v0 }
  0x8b   : > { %v312_v5 = vsub.f32 0.0, %v310_v1 }
  0x8d   : > { %v331_v7 = vadd.f32 %v312_v5, %v311_v2 }
  0x8f   : > { %v332_v8 = vadd.f32 %v331_v7, %v330_v6 }
  0x91   : > { %333 = vst [vmem:[#allocation2 + $0x8] sm:$0xff] %v332_v8 }
  0x92 PF: > { %p589_p4 = scmp.lt.s32.totalorder %s872_s14, 1 }
  0x93   : > { %s590_s21 = sshll.u32 (!%p589_p4), %s872_s14, 11 }
  0x94   : > { %337 = sbr.rel (%p589_p4) target bundleno = 213 (0xd5), region = 48 }
  0x99   : > { %v1066_v3 = vld [vmem:[%s1030_s3] sm:$0xff]  ;;  %v1069_v9 = vld [vmem:[%s1030_s3 + $0x8] sm:$0xff]  ;;  %v400_v4 = vlaneseq  ;;  %v411_v15 = vstv %s590_s21 }
  0x9a   : > { %v342_v10 = vand.u32 2147483647, %v1066_v3  ;;  %v343_v11 = vand.u32 2147483647, %v1069_v9  ;;  %v1077_v25 = vld [vmem:[%s1036_s4] sm:$0xff]  ;;  %v1086_v28 = vld [vmem:[%s1036_s4 + $0x8] sm:$0xff] }
  0x9b   : > { %v401_v12 = vshrl.u32 %v400_v4, 7  ;;  %v404_v17 = vand.u32 127, %v400_v4  ;;  %v436_v30 = vld [vmem:[#allocation2 + $0x18] sm:$0xff]  ;;  %v380_v41 = vsub.f32 0.0, %v1066_v3  ;;  %v381_v42 = vsub.f32 0.0, %v1069_v9  ;;  %v431_v63 = vld [vmem:[#allocation2] sm:$0xff] }
  0x9c   : > { %v344_v13 = vsub.f32 0.0, %v342_v10  ;;  %v345_v14 = vsub.f32 0.0, %v343_v11  ;;  %vm356_vm4 = vcmp.ge.f32.partialorder %v1066_v3, 0.0  ;;  %vm357_vm5 = vcmp.ge.f32.partialorder %v1069_v9, 0.0  ;;  %v426_v8 = vld [vmem:[#allocation2 + $0x10] sm:$0xff] }
  0x9d   : > { %v402_v16 = vadd.s32 8, %v401_v12  ;;  %v409_v18 = vmul.u32 128, %v401_v12  ;;  %v374_v50 = vmin.f32 %v1066_v3, 0.0  ;;  %v375_v51 = vmin.f32 %v1069_v9, 0.0 }
  0x9e   : > { %v346_v19 = vmul.f32 1.442695, %v344_v13  ;;  %v348_v20 = vmul.f32 1.442695, %v345_v14  ;;  %v382_v55 = vmin.f32 %v380_v41, 0.0  ;;  %v383_v56 = vmin.f32 %v381_v42, 0.0 }
  0x9f   : > { %v410_v21 = vmul.u32 128, %v402_v16  ;;  %v412_v22 = vadd.s32 %v411_v15, %v409_v18  ;;  %v390_v6 = vsub.f32 1.0, %v1077_v25  ;;  %v391_v4 = vsub.f32 1.0, %v1086_v28 }
  0xa0   : > { %707 = vpow2.f32 %v346_v19 }
  0xa1   : > { %709 = vpow2.f32 %v348_v20  ;;  %v413_v23 = vadd.s32 %v411_v15, %v410_v21  ;;  %v1074_v24 = vadd.s32 %v412_v22, %v404_v17 }
  0xa3   : > { %v1079_v26 = vadd.s32 %v413_v23, %v404_v17  ;;  %vm416_vm2 = vcmp.lt.s32.totalorder %v1074_v24, 2048 }
  0xa4   : > { %v422_v27 = vsel %vm416_vm2, %v1077_v25, 0.0 }
  0xa5   : > { %vm417_vm3 = vcmp.lt.s32.totalorder %v1079_v26, 2048 }
  0xa6   : > { %v423_v29 = vsel %vm417_vm3, %v1086_v28, 0.0 }
  0xa7   : > { %v437_v31 = vadd.f32 %v423_v29, %v422_v27 }
  0xa9   : > { %v438_v32 = vadd.f32 %v437_v31, %v436_v30 }
  0xab   : > { %439 = vst [vmem:[#allocation2 + $0x18] sm:$0xff] %v438_v32 }
  0xad   : > { %v708_v33 = vpop.eup %707 }
  0xae   : > { %v710_v34 = vpop.eup %709  ;;  %v350_v35 = vadd.f32 1.0, %v708_v33  ;;  %v366_v37 = vmul.f32 0.5, %v708_v33 }
  0xaf   : > { %v351_v36 = vadd.f32 1.0, %v710_v34  ;;  %v367_v38 = vmul.f32 0.5, %v710_v34 }
  0xb0   : > { %711 = vrcp.f32 %v350_v35  ;;  %v368_v39 = vmul.f32 %v708_v33, %v366_v37 }
  0xb1   : > { %713 = vrcp.f32 %v351_v36  ;;  %v369_v40 = vmul.f32 %v710_v34, %v367_v38 }
  0xb2   : > { %715 = vlog2.f32 %v350_v35  ;;  %v370_v46 = vsub.f32 %v708_v33, %v368_v39 }
  0xb3   : > { %717 = vlog2.f32 %v351_v36  ;;  %v371_v49 = vsub.f32 %v710_v34, %v369_v40 }
  0xbd   : > { %v712_v43 = vpop.eup %711 }
  0xbe   : > { %v714_v44 = vpop.eup %713  ;;  %v358_v45 = vmul.f32 %v712_v43, %v708_v33  ;;  %v441_v33 = vld [vmem:[#allocation2 + $0x8] sm:$0xff] }
  0xbf   : > { %v716_v47 = vpop.eup %715  ;;  %v359_v48 = vmul.f32 %v714_v44, %v710_v34 }
  0xc0   : > { %v718_v52 = vpop.eup %717  ;;  %v360_v53 = vsel %vm356_vm4, %v712_v43, %v358_v45  ;;  %v363_v54 = vmul.f32 0.6931472, %v716_v47 }
  0xc1   : > { %v361_v57 = vsel %vm357_vm5, %v714_v44, %v359_v48  ;;  %v398_v58 = vmul.f32 %v360_v53, %v1077_v25  ;;  %v420_v59 = vsel %vm416_vm2, %v360_v53, 0.0  ;;  %v365_v60 = vmul.f32 0.6931472, %v718_v52 }
  0xc2   : > { %v399_v61 = vmul.f32 %v361_v57, %v1086_v28  ;;  %v421_v62 = vsel %vm417_vm3, %v361_v57, 0.0  ;;  %v372_v0 = vmax.f32 %v363_v54, %v370_v46 }
  0xc3   : > { %v418_v1 = vsel %vm416_vm2, %v398_v58, 0.0  ;;  %v432_v2 = vadd.f32 %v421_v62, %v420_v59  ;;  %v373_v5 = vmax.f32 %v365_v60, %v371_v49 }
  0xc4   : > { %v419_v7 = vsel %vm417_vm3, %v399_v61, 0.0  ;;  %v376_v3 = vsub.f32 %v374_v50, %v372_v0  ;;  %v384_v9 = vsub.f32 %v382_v55, %v372_v0 }
  0xc5   : > { %v427_v10 = vadd.f32 %v419_v7, %v418_v1  ;;  %v433_v11 = vadd.f32 %v432_v2, %v431_v63  ;;  %v377_v12 = vsub.f32 %v375_v51, %v373_v5  ;;  %v385_v13 = vsub.f32 %v383_v56, %v373_v5 }
  0xc6   : > { %v378_v14 = vmax.f32 %v376_v3, -100.0  ;;  %v386_v15 = vmax.f32 %v384_v9, -100.0 }
  0xc7   : > { %v428_v16 = vadd.f32 %v427_v10, %v426_v8  ;;  %434 = vst [vmem:[#allocation2] sm:$0xff] %v433_v11  ;;  %v379_v17 = vmax.f32 %v377_v12, -100.0  ;;  %v387_v18 = vmax.f32 %v385_v13, -100.0 }
  0xc8   : > { %v388_v19 = vmul.f32 %v378_v14, %v1077_v25  ;;  %v392_v20 = vmul.f32 %v390_v6, %v386_v15 }
  0xc9   : > { %429 = vst [vmem:[#allocation2 + $0x10] sm:$0xff] %v428_v16  ;;  %v389_v21 = vmul.f32 %v379_v17, %v1086_v28  ;;  %v393_v22 = vmul.f32 %v391_v4, %v387_v18 }
  0xca   : > { %v394_v23 = vadd.f32 %v392_v20, %v388_v19 }
  0xcb   : > { %v395_v27 = vadd.f32 %v393_v22, %v389_v21 }
  0xcc   : > { %v396_v29 = vsub.f32 0.0, %v394_v23 }
  0xcd   : > { %v397_v30 = vsub.f32 0.0, %v395_v27 }
  0xce   : > { %v424_v31 = vsel %vm416_vm2, %v396_v29, 0.0 }
  0xcf   : > { %v425_v32 = vsel %vm417_vm3, %v397_v30, 0.0 }
  0xd0   : > { %v442_v34 = vadd.f32 %v425_v32, %v424_v31 }
  0xd2   : > { %v443_v35 = vadd.f32 %v442_v34, %v441_v33 }
  0xd4   : > { %444 = vst [vmem:[#allocation2 + $0x8] sm:$0xff] %v443_v35 }
  0xd5 PF: > { %v448_v25 = vld [vmem:[#allocation2 + $0x10] sm:$0xff]  ;;  %v449_v28 = vld [vmem:[#allocation2] sm:$0xff]  ;;  %v450_v24 = vld [vmem:[#allocation2 + $0x18] sm:$0xff]  ;;  %s598_s27 = sshll.u32 %s872_s14, 9  ;;  %s470_s7 = sshll.u32 %s1045_s22, 4  ;;  %s1127_s7 = int_to_ptr.vmem [resolvable:$true] %s470_s7 }
  0xd6   : > { %452 = vst [vmem:[%s1045_s22] sm:$0xff] %v448_v25  ;;  %453 = vst [vmem:[%s1045_s22 + $0x8] sm:$0xff] %v449_v28  ;;  %s1123_s28 = scalar_lea.hbm %s1184_s2, %s598_s27  ;;  %s1131_s8 = scalar_lea.sflag [#allocation5], %s229_s12 }
  0xd7   : > { %454 = vst [vmem:[%s1045_s22 + $0x10] sm:$0xff] %v450_v24  ;;  %s775_s14 = scalar_lea.vmem %s1127_s7, 512  ;;  %p1195_p13 = scmp.ne.s32.totalorder %s1189_s25, 0 }
  0xd8   : > { %p776_p12 = scmp.ne.s32.totalorder %s1127_s7, %s775_s14  ;;  %s887_s18 = smov [#allocation8]  }
  0xd9   : > { %s779_s20 = sshll.u32 %s887_s18, 4  ;;  %s780_s20 = int_to_ptr.vmem [resolvable:$false] %s779_s20 }
  0xda   : > { %p777_p0 = pnand %p776_p12, %p1195_p13  ;;  %s781_s23 = scalar_lea.vmem %s780_s20, 1024 }
  0xdb   : > { %v451_v26 = vld [vmem:[#allocation2 + $0x8] sm:$0xff]  ;;  %p782_p9 = scmp.lt.s32.totalorder %s1127_s7, %s780_s20  ;;  %p783_p10 = scmp.lt.s32.totalorder %s781_s23, %s775_s14 }
  0xdc   : > { %455 = vst [vmem:[%s1045_s22 + $0x18] sm:$0xff] %v451_v26  ;;  %p778_p8 = pneg %p777_p0 }
  0xdd   : > { %p784_p11 = por %p783_p10, %p782_p9 }
  0xdf   : > { %p785_p1 = pnand %p784_p11, %p778_p8 }
  0xe1   : > { %788 = shalt.err (!%p785_p1)
}
  0xe2   : > { %s789_s30 = scalar_lea.hbm %s1123_s28, 512  ;;  %s793_s4 = scalar_lea.hbm %s1184_s2, 1024 }
  0xe3   : > { %p790_p3 = scmp.ne.s32.totalorder %s1123_s28, %s789_s30  ;;  %p794_p5 = scmp.lt.s32.totalorder %s1123_s28, %s1184_s2 }
  0xe4   : > { %p795_p2 = scmp.lt.s32.totalorder %s793_s4, %s789_s30 }
  0xe5   : > { %p791_p7 = pnand %p790_p3, %p1195_p13 }
  0xe6   : > { %p796_p4 = por %p795_p2, %p794_p5 }
  0xe7   : > { %p792_p6 = pneg %p791_p7 }
  0xe9   : > { %p797_p12 = pnand %p796_p4, %p792_p6 }
  0xeb   : > { %800 = shalt.err (!%p797_p12)
}
  0xec   : > { %s888_s22 = smov 128   ;;  %s889_s21 = smov 8  }
  0xed   : > { %603 = dma.vmem_to_hbm [thread:$0]  (%p1195_p13), %s1127_s7, 512, %s1123_s28, %s1131_s8, %s888_s22, %s888_s22, %s889_s21  }
  0xee PF: > { %s485_s27 = sand.u32 1, %s852_s9   ;;  %p1196_p0 = scmp.ne.s32.totalorder %s1190_s26, 0 }
  0xef   : > { %p1197_p8 = scmp.ge.s32.totalorder %s880_s16, 2  ;;  %s486_s5 = scalar_lea.sflag [#allocation5], %s485_s27 }
  0xf1   : > { %p613_p9 = pnand %p1197_p8, %p1196_p0 }
  0xf3   : > { %p614_p10 = pneg %p613_p9 }
  0xf5   : > { %846 = dma.done.wait (%p614_p10), %s486_s5, 512  }
  0xf6   : > { %848 = vsyncadd (%p614_p10), %s486_s5, 4294966784  ;;  %s21_s16 = sadd.s32 1, %s880_s16   ;;  %s1198_s9 = smov %s856_s10 }
  0xf7   : > { %p18_p11 = scmp.ge.s32.totalorder %s21_s16, 4   ;;  %s1199_s10 = smov %s860_s11 }
  0xf8   : > { %s1200_s11 = smov %s963_s24  ;;  %s1201_s12 = smov %s868_s13 }
  0xf9   : > { %s1172_s13 = smov 0   ;;  %s1202_s14 = smov %s876_s15 }
  0xfa   : > { %s1203_s15 = smov %s1205_s19  ;;  %20 = sbr.rel (!%p18_p11) target bundleno = 9 (0x9), region = 108 }
  0xff   :  { %491 = vsyncpa [#allocation4], 1 }
 0x100   :  { %493 = vsyncpa [#allocation4 + $0x1], 1 }
 0x101   :  { %494 = vsyncpa [#allocation7], 1 }
 0x102   :  { %496 = vsyncpa [#allocation7 + $0x1], 1 }
 0x103   :  { %497 = vsyncpa [#allocation5], 1 }
 0x104   :  { %499 = vsyncpa [#allocation5 + $0x1], 1 }

</bundles_post_ra>
